<compile_context>
chip_gen: v7x
topology: tpu7x:2x2x1
jax: 0.10.0
libtpu: 0.0.40
codegen_flags: <defaults>
</compile_context>

<pallas_src>
import jax
import jax.numpy as jnp
from jax.experimental import pallas as pl
from jax.experimental.pallas import tpu as pltpu

_HIDDEN_PAD = 128  # hidden size 100 padded to a full 128-lane tile


def _round_up(x, m):
    return (x + m - 1) // m * m


def _mlp_kernel(x_ref, w1_ref, b1_ref, w2_ref, b2_ref, w3_ref, b3_ref, o_ref):
    # Layer 1: single fused matmul over the concatenated input (bf16 in, f32 accumulate).
    h1 = jnp.dot(x_ref[...], w1_ref[...],
                 preferred_element_type=jnp.float32) + b1_ref[...]
    h1 = jnp.maximum(h1, 0.0)                                   # ReLU in f32 (VPU)

    # Layer 2: [TB,128] x [128,128] full-tile MXU matmul.
    h2 = jnp.dot(h1.astype(jnp.bfloat16), w2_ref[...],
                 preferred_element_type=jnp.float32) + b2_ref[...]
    h2 = jnp.maximum(h2, 0.0)                                   # ReLU in f32

    # Layer 3 (out_features = 1): VPU multiply + lane reduction instead of an N=1 MXU matmul.
    # w3_ref is (1, 128) f32 (zero-padded past column 99); b3 is a scalar read from SMEM.
    out = jnp.sum(h2 * w3_ref[...], axis=-1, keepdims=True) + b3_ref[0, 0]
    o_ref[...] = out


def t_forward(x1, x2, params, *, tb=None):
    """Pallas implementation of T.forward.

    x1, x2: arrays with leading batch dim; flattened like x.view(B, -1).
    params: dict with w1 [size1+size2,100], b1 [1,100], w2 [100,100], b2 [1,100],
            w3 [100,1], b3 [1,1]  (float32).
    Returns float32 array of shape (B, 1).
    """
    B = x1.shape[0]
    x1 = x1.astype(jnp.float32).reshape(B, -1)
    x2 = x2.astype(jnp.float32).reshape(B, -1)
    x = jnp.concatenate([x1, x2], axis=1)            # fused layer-1 input, (B, D_in)
    d_in = x.shape[1]

    hidden = params["w2"].shape[0]                   # 100
    H = _HIDDEN_PAD

    # Zero-pad parameters to 128-wide tiles; matmul weights in bf16, biases / w3 in f32.
    w1 = jnp.zeros((d_in, H), jnp.float32).at[:, :hidden].set(params["w1"]).astype(jnp.bfloat16)
    b1 = jnp.zeros((1, H), jnp.float32).at[:, :hidden].set(params["b1"])
    w2 = jnp.zeros((H, H), jnp.float32).at[:hidden, :hidden].set(params["w2"]).astype(jnp.bfloat16)
    b2 = jnp.zeros((1, H), jnp.float32).at[:, :hidden].set(params["b2"])
    w3 = jnp.zeros((1, H), jnp.float32).at[:, :hidden].set(params["w3"].reshape(1, hidden))
    b3 = params["b3"].reshape(1, 1).astype(jnp.float32)

    # Batch tiling: large tiles amortize per-step overhead; pad B to a multiple of the tile.
    if tb is None:
        tb = 1024 if B >= 1024 else _round_up(max(B, 8), 128)
    b_pad = _round_up(B, tb)

    x = x.astype(jnp.bfloat16)
    if b_pad != B:
        x = jnp.pad(x, ((0, b_pad - B), (0, 0)))
    grid = (b_pad // tb,)

    out = pl.pallas_call(
        _mlp_kernel,
        out_shape=jax.ShapeDtypeStruct((b_pad, 1), jnp.float32),
        grid=grid,
        in_specs=[
            pl.BlockSpec((tb, d_in), lambda i: (i, 0)),   # streamed batch tile
            pl.BlockSpec((d_in, H), lambda i: (0, 0)),    # resident weights / biases
            pl.BlockSpec((1, H), lambda i: (0, 0)),
            pl.BlockSpec((H, H), lambda i: (0, 0)),
            pl.BlockSpec((1, H), lambda i: (0, 0)),
            pl.BlockSpec((1, H), lambda i: (0, 0)),
            pl.BlockSpec(memory_space=pltpu.MemorySpace.SMEM),  # scalar b3 via SMEM
        ],
        out_specs=pl.BlockSpec((tb, 1), lambda i: (i, 0)),
        compiler_params=pltpu.CompilerParams(
            dimension_semantics=("parallel",),
            vmem_limit_bytes=32 * 1024 * 1024,
        ),
    )(x, w1, b1, w2, b2, w3, b3)

    return out[:B]


def init_params(key, size1, size2, hidden=100):
    """Deterministic init matching nn.Linear shapes (uniform(-1/sqrt(fan_in), 1/sqrt(fan_in)))."""
    d_in = size1 + size2
    ks = jax.random.split(key, 6)

    def lin(kw, kb, fan_in, fan_out):
        bound = 1.0 / jnp.sqrt(fan_in)
        w = jax.random.uniform(kw, (fan_in, fan_out), jnp.float32, -bound, bound)
        b = jax.random.uniform(kb, (1, fan_out), jnp.float32, -bound, bound)
        return w, b

    w1, b1 = lin(ks[0], ks[1], d_in, hidden)
    w2, b2 = lin(ks[2], ks[3], hidden, hidden)
    w3, b3 = lin(ks[4], ks[5], hidden, 1)
    return {"w1": w1, "b1": b1, "w2": w2, "b2": b2, "w3": w3, "b3": b3}


if __name__ == "__main__":
    key = jax.random.PRNGKey(0)
    k1, k2, kp = jax.random.split(key, 3)

    B = 8
    # x1 has extra dims to exercise the .view(B, -1) flatten; x2 is already flat.
    x1 = jax.random.normal(k1, (B, 4, 4), jnp.float32)   # flattens to size1 = 16
    x2 = jax.random.normal(k2, (B, 16), jnp.float32)     # size2 = 16
    size1, size2 = 16, 16

    params = init_params(kp, size1, size2)

    out = t_forward(x1, x2, params)
    out = jax.block_until_ready(out)

    # Reference check in plain f32 JAX (kernel uses bf16 matmul inputs -> loose tolerance).
    cat = jnp.concatenate([x1.reshape(B, -1), x2.reshape(B, -1)], axis=1)
    h = jnp.maximum(cat @ params["w1"] + params["b1"], 0.0)
    h = jnp.maximum(h @ params["w2"] + params["b2"], 0.0)
    ref = h @ params["w3"] + params["b3"]

    assert out.shape == (B, 1)
    assert jnp.allclose(out, ref, atol=5e-2, rtol=5e-2)

    print("KERNEL_OK")
</pallas_src>

<mosaic_0001>
module attributes {stable_mosaic.version = 11 : i64} {
  func.func @_mlp_kernel(%arg0: i32, %arg1: memref<128x32xbf16, #tpu.memory_space<vmem>>, %arg2: memref<32x128xbf16, #tpu.memory_space<vmem>>, %arg3: memref<1x128xf32, #tpu.memory_space<vmem>>, %arg4: memref<128x128xbf16, #tpu.memory_space<vmem>>, %arg5: memref<1x128xf32, #tpu.memory_space<vmem>>, %arg6: memref<1x128xf32, #tpu.memory_space<vmem>>, %arg7: memref<1x1xf32, #tpu.memory_space<smem>>, %arg8: memref<128x1xf32, #tpu.memory_space<vmem>>) attributes {dimension_semantics = [#tpu.dimension_semantics<parallel>], iteration_bounds = array<i64: 1>, scalar_prefetch = 0 : i64, scratch_operands = 0 : i64, tpu.core_type = #tpu.core_type<tc>, window_params = [{transform_indices = @transform_0, window_bounds = array<i64: 128, 32>}, {pipeline_mode = #tpu.pipeline_mode<synchronous>, transform_indices = @transform_1, window_bounds = array<i64: 32, 128>}, {pipeline_mode = #tpu.pipeline_mode<synchronous>, transform_indices = @transform_2, window_bounds = array<i64: 1, 128>}, {pipeline_mode = #tpu.pipeline_mode<synchronous>, transform_indices = @transform_3, window_bounds = array<i64: 128, 128>}, {pipeline_mode = #tpu.pipeline_mode<synchronous>, transform_indices = @transform_4, window_bounds = array<i64: 1, 128>}, {pipeline_mode = #tpu.pipeline_mode<synchronous>, transform_indices = @transform_5, window_bounds = array<i64: 1, 128>}, {transform_indices = @transform_6, window_bounds = array<i64: 1, 1>}, {transform_indices = @transform_7, window_bounds = array<i64: 128, 1>}]} {
    %c0 = arith.constant 0 : index
    %c0_0 = arith.constant 0 : index
    %0 = vector.load %arg1[%c0, %c0_0] : memref<128x32xbf16, #tpu.memory_space<vmem>>, vector<128x32xbf16>
    %c0_1 = arith.constant 0 : index
    %c0_2 = arith.constant 0 : index
    %1 = vector.load %arg2[%c0_1, %c0_2] : memref<32x128xbf16, #tpu.memory_space<vmem>>, vector<32x128xbf16>
    %cst = arith.constant dense<0.000000e+00> : vector<128x128xf32>
    %2 = tpu.matmul %0, %1, %cst {dimension_numbers = #tpu.dot_dimension_numbers<[1], [0], [0], [1], [0, 0, 1, 1], [], []>} : vector<128x32xbf16>, vector<32x128xbf16>, vector<128x128xf32> -> vector<128x128xf32>
    %c0_3 = arith.constant 0 : index
    %c0_4 = arith.constant 0 : index
    %3 = vector.load %arg3[%c0_3, %c0_4] : memref<1x128xf32, #tpu.memory_space<vmem>>, vector<1x128xf32>
    %4 = vector.broadcast %3 : vector<1x128xf32> to vector<128x128xf32>
    %5 = arith.addf %2, %4 : vector<128x128xf32>
    %cst_5 = arith.constant 0.000000e+00 : f32
    %6 = vector.broadcast %cst_5 : f32 to vector<128x128xf32>
    %7 = arith.maximumf %5, %6 : vector<128x128xf32>
    %8 = arith.truncf %7 : vector<128x128xf32> to vector<128x128xbf16>
    %c0_6 = arith.constant 0 : index
    %c0_7 = arith.constant 0 : index
    %9 = vector.load %arg4[%c0_6, %c0_7] : memref<128x128xbf16, #tpu.memory_space<vmem>>, vector<128x128xbf16>
    %cst_8 = arith.constant dense<0.000000e+00> : vector<128x128xf32>
    %10 = tpu.matmul %8, %9, %cst_8 {dimension_numbers = #tpu.dot_dimension_numbers<[1], [0], [0], [1], [0, 0, 1, 1], [], []>} : vector<128x128xbf16>, vector<128x128xbf16>, vector<128x128xf32> -> vector<128x128xf32>
    %c0_9 = arith.constant 0 : index
    %c0_10 = arith.constant 0 : index
    %11 = vector.load %arg5[%c0_9, %c0_10] : memref<1x128xf32, #tpu.memory_space<vmem>>, vector<1x128xf32>
    %12 = vector.broadcast %11 : vector<1x128xf32> to vector<128x128xf32>
    %13 = arith.addf %10, %12 : vector<128x128xf32>
    %cst_11 = arith.constant 0.000000e+00 : f32
    %14 = vector.broadcast %cst_11 : f32 to vector<128x128xf32>
    %15 = arith.maximumf %13, %14 : vector<128x128xf32>
    %c0_12 = arith.constant 0 : index
    %c0_13 = arith.constant 0 : index
    %16 = vector.load %arg6[%c0_12, %c0_13] : memref<1x128xf32, #tpu.memory_space<vmem>>, vector<1x128xf32>
    %17 = vector.broadcast %16 : vector<1x128xf32> to vector<128x128xf32>
    %18 = arith.mulf %15, %17 : vector<128x128xf32>
    %cst_14 = arith.constant dense<0.000000e+00> : vector<128xf32>
    %19 = vector.multi_reduction <add>, %18, %cst_14 [1] : vector<128x128xf32> to vector<128xf32>
    %20 = vector.shape_cast %19 : vector<128xf32> to vector<128x1xf32>
    %c0_15 = arith.constant 0 : index
    %c0_16 = arith.constant 0 : index
    %21 = memref.load %arg7[%c0_15, %c0_16] : memref<1x1xf32, #tpu.memory_space<smem>>
    %22 = vector.broadcast %21 : f32 to vector<128x1xf32>
    %23 = arith.addf %20, %22 : vector<128x1xf32>
    %c0_17 = arith.constant 0 : index
    %c0_18 = arith.constant 0 : index
    %24 = vector.load %arg8[%c0_17, %c0_18] : memref<128x1xf32, #tpu.memory_space<vmem>>, vector<128x1xf32>
    tpu.vector_store %arg8[%c0_17, %c0_18], %23 {strides = array<i32>} : memref<128x1xf32, #tpu.memory_space<vmem>>, vector<128x1xf32>,
    return
  }
  func.func @transform_0(%arg0: i32) -> (i32, i32) {
    %c0_i32 = arith.constant 0 : i32
    %c0_i32_0 = arith.constant 0 : i32
    return %arg0, %c0_i32 : i32, i32
  }
  func.func @transform_1(%arg0: i32) -> (i32, i32) {
    %c0_i32 = arith.constant 0 : i32
    %c0_i32_0 = arith.constant 0 : i32
    %c0_i32_1 = arith.constant 0 : i32
    return %c0_i32, %c0_i32_0 : i32, i32
  }
  func.func @transform_2(%arg0: i32) -> (i32, i32) {
    %c0_i32 = arith.constant 0 : i32
    %c0_i32_0 = arith.constant 0 : i32
    %c0_i32_1 = arith.constant 0 : i32
    return %c0_i32, %c0_i32_0 : i32, i32
  }
  func.func @transform_3(%arg0: i32) -> (i32, i32) {
    %c0_i32 = arith.constant 0 : i32
    %c0_i32_0 = arith.constant 0 : i32
    %c0_i32_1 = arith.constant 0 : i32
    return %c0_i32, %c0_i32_0 : i32, i32
  }
  func.func @transform_4(%arg0: i32) -> (i32, i32) {
    %c0_i32 = arith.constant 0 : i32
    %c0_i32_0 = arith.constant 0 : i32
    %c0_i32_1 = arith.constant 0 : i32
    return %c0_i32, %c0_i32_0 : i32, i32
  }
  func.func @transform_5(%arg0: i32) -> (i32, i32) {
    %c0_i32 = arith.constant 0 : i32
    %c0_i32_0 = arith.constant 0 : i32
    %c0_i32_1 = arith.constant 0 : i32
    return %c0_i32, %c0_i32_0 : i32, i32
  }
  func.func @transform_6(%arg0: i32) -> (i32, i32) {
    %c0_i32 = arith.constant 0 : i32
    %c0_i32_0 = arith.constant 0 : i32
    %c0_i32_1 = arith.constant 0 : i32
    return %c0_i32, %c0_i32_0 : i32, i32
  }
  func.func @transform_7(%arg0: i32) -> (i32, i32) {
    %c0_i32 = arith.constant 0 : i32
    %c0_i32_0 = arith.constant 0 : i32
    return %arg0, %c0_i32 : i32, i32
  }
}

</mosaic_0001>

<bundles_post_ra>
// kernel: tpu_custom_call.1
= control target key start
LH: loop header
LB: loop body
LE: loop exit
PB: predicated region body
PF: predicated region fallthrough
CT: control target
= control target key end

     0   :  { %vm107_vm0 = vcmask 261120   ;;  %vm510_vm1 = vcmask 7168   ;;  %s886_s1 = inlined_call_operand.vmem [shape: bf16[32,128], index: 1, kind: input, shape index: {}]   ;;  %s887_s0 = inlined_call_operand.vmem [shape: bf16[128,32], index: 0, kind: input, shape index: {}]   ;;  %s888_s3 = inlined_call_operand.vmem [shape: bf16[128,128], index: 3, kind: input, shape index: {}]   ;;  %s889_s2 = inlined_call_operand.vmem [shape: f32[1,128], index: 2, kind: input, shape index: {}]   ;;  %s890_s4 = inlined_call_operand.vmem [shape: f32[1,128], index: 4, kind: input, shape index: {}]   ;;  %s891_s5 = inlined_call_operand.vmem [shape: f32[1,128], index: 5, kind: input, shape index: {}]   ;;  %s892_s6 = inlined_call_operand.<no memory space> [shape: f32[1,1], index: 6, kind: input, shape index: {}]   ;;  %s893_s7 = inlined_call_operand.vmem [shape: f32[128,1], index: 7, kind: output, shape index: {}]  }
   0x1   :  { %v654_v0 = vld [vmem:[%s886_s1] sm:$0xff]   ;;  %v655_v1 = vld [vmem:[%s886_s1 + $0x8] sm:$0xff]   ;;  %v658_v4 = vld [vmem:[%s887_s0 + $0x10] sm:$0xff]  }
   0x2   :  { %586 = vmatprep.subr.bf16.mxu0 %v654_v0  ;;  %v656_v2 = vld [vmem:[%s887_s0] sm:$0xff]   ;;  %v657_v3 = vld [vmem:[%s887_s0 + $0x8] sm:$0xff]   ;;  %v659_v7 = vld [vmem:[%s887_s0 + $0x18] sm:$0xff]  }
   0x3   :  { %587 = vmatpush3.bf16.msra.mxu0 %v654_v0  ;;  %590 = vmatprep.mubr.msk.bf16.mxu0 %vm107_vm0, %v656_v2  ;;  %v664_v5 = vld [vmem:[%s888_s3] sm:$0xff]   ;;  %v665_v6 = vld [vmem:[%s888_s3 + $0x8] sm:$0xff]   ;;  %v666_v8 = vld [vmem:[%s888_s3 + $0x10] sm:$0xff]  }
   0x4   :  { %588 = vmatprep.subr.bf16.mxu0 %v655_v1  ;;  %638 = vmatprep.subr.bf16.mxu1 %v664_v5  ;;  %v660_v9 = vld [vmem:[%s887_s0 + $0x20] sm:$0xff]   ;;  %v667_v10 = vld [vmem:[%s888_s3 + $0x18] sm:$0xff]   ;;  %v661_v11 = vld [vmem:[%s887_s0 + $0x28] sm:$0xff]  }
   0x5   :  { %646 = vmatpush3.bf16.msra.mxu1 %v664_v5  ;;  %v668_v12 = vld [vmem:[%s888_s3 + $0x20] sm:$0xff]   ;;  %v662_v13 = vld [vmem:[%s887_s0 + $0x30] sm:$0xff]   ;;  %v669_v14 = vld [vmem:[%s888_s3 + $0x28] sm:$0xff]  }
   0x6   :  { %639 = vmatprep.subr.bf16.mxu1 %v665_v6  ;;  %v663_v15 = vld [vmem:[%s887_s0 + $0x38] sm:$0xff]   ;;  %v670_v16 = vld [vmem:[%s888_s3 + $0x30] sm:$0xff]   ;;  %v531_v18 = vld [vmem:[%s889_s2] ss:$0 sm:$0xff] }
   0x7   :  { %589 = vmatpush3.bf16.msra.mxu0 %v655_v1  ;;  %v671_v17 = vld [vmem:[%s888_s3 + $0x38] sm:$0xff]  }
   0x8   :  { %606 = vmatprep.subr.bf16.mxu0 %v664_v5 }
   0x9   :  { %647 = vmatpush3.bf16.msra.mxu1 %v665_v6 }
   0xa   :  { %591 = vmatmul.mubr.msk.bf16.vlgmr.msra.gmra.mrb[0].mxu0 %vm107_vm0, %v657_v3  ;;  %640 = vmatprep.subr.bf16.mxu1 %v666_v8 }
   0xb   :  { %594 = vmatprep.mubr.msk.bf16.mxu0 %vm107_vm0, %v658_v4  ;;  %607 = vmatpush3.bf16.msra.mxu0 %v664_v5 }
   0xc   :  { %608 = vmatprep.subr.bf16.mxu0 %v665_v6 }
   0xd   :  { %648 = vmatpush3.bf16.msra.mxu1 %v666_v8 }
   0xe   :  { %641 = vmatprep.subr.bf16.mxu1 %v667_v10 }
   0xf   :  { %609 = vmatpush3.bf16.msra.mxu0 %v665_v6 }
  0x10   :  { %610 = vmatprep.subr.bf16.mxu0 %v666_v8 }
  0x11   :  { %649 = vmatpush3.bf16.msra.mxu1 %v667_v10 }
  0x12   :  { %595 = vmatmul.mubr.msk.bf16.gmra.mrb[4].mxu0 %vm107_vm0, %v659_v7  ;;  %642 = vmatprep.subr.bf16.mxu1 %v668_v12 }
  0x13   :  { %598 = vmatprep.mubr.msk.bf16.mxu0 %vm107_vm0, %v660_v9  ;;  %611 = vmatpush3.bf16.msra.mxu0 %v666_v8 }
  0x14   :  { %612 = vmatprep.subr.bf16.mxu0 %v667_v10 }
  0x15   :  { %650 = vmatpush3.bf16.msra.mxu1 %v668_v12 }
  0x16   :  { %643 = vmatprep.subr.bf16.mxu1 %v669_v14 }
  0x17   :  { %613 = vmatpush3.bf16.msra.mxu0 %v667_v10 }
  0x18   :  { %614 = vmatprep.subr.bf16.mxu0 %v668_v12 }
  0x19   :  { %651 = vmatpush3.bf16.msra.mxu1 %v669_v14 }
  0x1a   :  { %599 = vmatmul.mubr.msk.bf16.gmra.mrb[8].mxu0 %vm107_vm0, %v661_v11  ;;  %644 = vmatprep.subr.bf16.mxu1 %v670_v16  ;;  %v780_v11 = vld [vmem:[%s890_s4] ss:$0 sm:$0xff] }
  0x1b   :  { %602 = vmatprep.mubr.msk.bf16.mxu0 %vm107_vm0, %v662_v13  ;;  %615 = vmatpush3.bf16.msra.mxu0 %v668_v12 }
  0x1c   :  { %616 = vmatprep.subr.bf16.mxu0 %v669_v14 }
  0x1d   :  { %652 = vmatpush3.bf16.msra.mxu1 %v670_v16 }
  0x1e   :  { %645 = vmatprep.subr.bf16.mxu1 %v671_v17 }
  0x1f   :  { %617 = vmatpush3.bf16.msra.mxu0 %v669_v14 }
  0x20   :  { %618 = vmatprep.subr.bf16.mxu0 %v670_v16 }
  0x21   :  { %653 = vmatpush3.bf16.msra.mxu1 %v671_v17 }
  0x22   :  { %603 = vmatmul.mubr.msk.bf16.gmra.mrb[12].mxu0 %vm107_vm0, %v663_v15 }
  0x23   :  { %619 = vmatpush3.bf16.msra.mxu0 %v670_v16 }
  0x24   :  { %620 = vmatprep.subr.bf16.mxu0 %v671_v17 }
  0x27   :  { %621 = vmatpush3.bf16.msra.mxu0 %v671_v17  ;;  %v787_v17 = vld [vmem:[%s891_s5] ss:$0 sm:$0xff] }
  0xdd   :  { %v592_v19 = vpop.f32.mrb[0].mxu0 }
  0xde   :  { %v175_v20 = vadd.f32 %v592_v19, %v531_v18  ;;  %v166_v21 = vpop.f32.mrb[1].mxu0 }
  0xdf   :  { %v167_v22 = vadd.f32 %v531_v18, %v166_v21  ;;  %v593_v23 = vpop.f32.mrb[2].mxu0 }
  0xe0   :  { %v178_v24 = vadd.f32 %v593_v23, %v531_v18  ;;  %v169_v25 = vpop.f32.mrb[3].mxu0  ;;  %v231_v27 = vmax.f32 %v175_v20, 0.0 }
  0xe1   :  { %v170_v26 = vadd.f32 %v531_v18, %v169_v25  ;;  %v229_v29 = vmax.f32 %v167_v22, 0.0 }
  0xe2   :  { %v232_v28 = vmax.f32 %v178_v24, 0.0 }
  0xe3   :  { %v230_v30 = vmax.f32 %v170_v26, 0.0 }
  0xe4   :  { %v246_v31 = vpack.c.bf16 %v232_v28, %v231_v27 }
  0xe5   :  { %v245_v32 = vpack.c.bf16 %v230_v30, %v229_v29  ;;  %v596_v33 = vpop.f32.mrb[4].mxu0 }
  0xe6   :  { %v191_v34 = vadd.f32 %v596_v33, %v531_v18  ;;  %v182_v35 = vpop.f32.mrb[5].mxu0 }
  0xe7   :  { %v183_v36 = vadd.f32 %v531_v18, %v182_v35  ;;  %v597_v37 = vpop.f32.mrb[6].mxu0  ;;  %622 = vmatprep.mubr.bf16.mxu0 %v245_v32 }
  0xe8   :  { %v194_v38 = vadd.f32 %v597_v37, %v531_v18  ;;  %v185_v39 = vpop.f32.mrb[7].mxu0  ;;  %623 = vmatmul.mubr.bf16.vlgmr.msra.gmra.mrb[16].mxu0 %v246_v31  ;;  %v235_v41 = vmax.f32 %v191_v34, 0.0 }
  0xe9   :  { %v186_v40 = vadd.f32 %v531_v18, %v185_v39  ;;  %v233_v43 = vmax.f32 %v183_v36, 0.0 }
  0xea   :  { %v236_v42 = vmax.f32 %v194_v38, 0.0 }
  0xeb   :  { %v234_v44 = vmax.f32 %v186_v40, 0.0 }
  0xec   :  { %v248_v45 = vpack.c.bf16 %v236_v42, %v235_v41 }
  0xed   :  { %v600_v46 = vpop.f32.mrb[8].mxu0  ;;  %v247_v47 = vpack.c.bf16 %v234_v44, %v233_v43 }
  0xee   :  { %v207_v48 = vadd.f32 %v600_v46, %v531_v18  ;;  %v198_v49 = vpop.f32.mrb[9].mxu0 }
  0xef   :  { %v199_v50 = vadd.f32 %v531_v18, %v198_v49  ;;  %v601_v51 = vpop.f32.mrb[10].mxu0  ;;  %626 = vmatprep.mubr.bf16.mxu1 %v247_v47 }
  0xf0   :  { %v210_v52 = vadd.f32 %v601_v51, %v531_v18  ;;  %v201_v53 = vpop.f32.mrb[11].mxu0  ;;  %627 = vmatmul.mubr.bf16.vlgmr.msra.gmra.mrb[0].mxu1 %v248_v45  ;;  %v239_v55 = vmax.f32 %v207_v48, 0.0 }
  0xf1   :  { %v202_v54 = vadd.f32 %v531_v18, %v201_v53  ;;  %v237_v57 = vmax.f32 %v199_v50, 0.0 }
  0xf2   :  { %v240_v56 = vmax.f32 %v210_v52, 0.0 }
  0xf3   :  { %v238_v58 = vmax.f32 %v202_v54, 0.0 }
  0xf4   :  { %v250_v59 = vpack.c.bf16 %v240_v56, %v239_v55 }
  0xf5   :  { %v249_v60 = vpack.c.bf16 %v238_v58, %v237_v57  ;;  %v604_v61 = vpop.f32.mrb[12].mxu0 }
  0xf6   :  { %v223_v62 = vadd.f32 %v604_v61, %v531_v18  ;;  %v214_v63 = vpop.f32.mrb[13].mxu0 }
  0xf7   :  { %v215_v0 = vadd.f32 %v531_v18, %v214_v63  ;;  %v605_v1 = vpop.f32.mrb[14].mxu0  ;;  %630 = vmatprep.mubr.bf16.mxu1 %v249_v60 }
  0xf8   :  { %v226_v2 = vadd.f32 %v605_v1, %v531_v18  ;;  %v217_v3 = vpop.f32.mrb[15].mxu0  ;;  %631 = vmatmul.mubr.bf16.gmra.mrb[4].mxu1 %v250_v59  ;;  %v243_v5 = vmax.f32 %v223_v62, 0.0 }
  0xf9   :  { %v218_v4 = vadd.f32 %v531_v18, %v217_v3  ;;  %v241_v7 = vmax.f32 %v215_v0, 0.0 }
  0xfa   :  { %v244_v6 = vmax.f32 %v226_v2, 0.0 }
  0xfb   :  { %v242_v8 = vmax.f32 %v218_v4, 0.0 }
  0xfc   :  { %v252_v9 = vpack.c.bf16 %v244_v6, %v243_v5 }
  0xfd   :  { %v251_v10 = vpack.c.bf16 %v242_v8, %v241_v7 }
  0xff   :  { %634 = vmatprep.mubr.bf16.mxu1 %v251_v10 }
 0x100   :  { %635 = vmatmul.mubr.bf16.gmra.mrb[8].mxu1 %v252_v9 }
 0x1bb   :  { %v624_v12 = vpop.f32.mrb[16].mxu0 }
 0x1bc   :  { %v367_v13 = vadd.f32 %v624_v12, %v780_v11  ;;  %v358_v14 = vpop.f32.mrb[17].mxu0 }
 0x1bd   :  { %v359_v15 = vadd.f32 %v780_v11, %v358_v14  ;;  %v625_v16 = vpop.f32.mrb[18].mxu0 }
 0x1be   :  { %v423_v18 = vmax.f32 %v367_v13, 0.0  ;;  %v370_v19 = vadd.f32 %v625_v16, %v780_v11  ;;  %v361_v20 = vpop.f32.mrb[19].mxu0 }
 0x1bf   :  { %v421_v21 = vmax.f32 %v359_v15, 0.0  ;;  %v362_v22 = vadd.f32 %v780_v11, %v361_v20 }
 0x1c0   :  { %v424_v23 = vmax.f32 %v370_v19, 0.0  ;;  %v446_v24 = vmul.f32 %v787_v17, %v423_v18 }
 0x1c1   :  { %v422_v25 = vmax.f32 %v362_v22, 0.0  ;;  %v444_v26 = vmul.f32 %v787_v17, %v421_v21 }
 0x1c2   :  { %464 = vadd.xlane.f32.xlu1 %v446_v24  ;;  %v447_v30 = vmul.f32 %v787_v17, %v424_v23 }
 0x1c3   :  { %v628_v27 = vpop.f32.mrb[0].mxu1  ;;  %460 = vadd.xlane.f32.xlu0 %v444_v26  ;;  %v445_v33 = vmul.f32 %v787_v17, %v422_v25 }
 0x1c4   :  { %v383_v28 = vadd.f32 %v628_v27, %v780_v11  ;;  %v374_v29 = vpop.f32.mrb[1].mxu1 }
 0x1c5   :  { %v375_v31 = vadd.f32 %v780_v11, %v374_v29  ;;  %v629_v32 = vpop.f32.mrb[2].mxu1 }
 0x1c6   :  { %v427_v34 = vmax.f32 %v383_v28, 0.0  ;;  %v386_v35 = vadd.f32 %v629_v32, %v780_v11  ;;  %v377_v36 = vpop.f32.mrb[3].mxu1  ;;  %466 = vadd.xlane.f32.xlu1 %v447_v30 }
 0x1c7   :  { %v378_v37 = vadd.f32 %v780_v11, %v377_v36  ;;  %462 = vadd.xlane.f32.xlu0 %v445_v33  ;;  %v425_v40 = vmax.f32 %v375_v31, 0.0 }
 0x1c8   :  { %v428_v38 = vmax.f32 %v386_v35, 0.0  ;;  %v450_v39 = vmul.f32 %v787_v17, %v427_v34 }
 0x1c9   :  { %v426_v41 = vmax.f32 %v378_v37, 0.0  ;;  %v448_v48 = vmul.f32 %v787_v17, %v425_v40 }
 0x1ca   :  { %v451_v42 = vmul.f32 %v787_v17, %v428_v38 }
 0x1cb   :  { %v632_v43 = vpop.f32.mrb[4].mxu1  ;;  %472 = vadd.xlane.f32.xlu0 %v450_v39  ;;  %v449_v52 = vmul.f32 %v787_v17, %v426_v41 }
 0x1cc   :  { %v399_v44 = vadd.f32 %v632_v43, %v780_v11  ;;  %v390_v45 = vpop.f32.mrb[5].mxu1  ;;  %474 = vadd.xlane.f32.xlu1 %v451_v42 }
 0x1cd   :  { %v391_v46 = vadd.f32 %v780_v11, %v390_v45  ;;  %v633_v47 = vpop.f32.mrb[6].mxu1 }
 0x1ce   :  { %v431_v49 = vmax.f32 %v399_v44, 0.0  ;;  %v402_v50 = vadd.f32 %v633_v47, %v780_v11  ;;  %v393_v51 = vpop.f32.mrb[7].mxu1 }
 0x1cf   :  { %v394_v53 = vadd.f32 %v780_v11, %v393_v51  ;;  %468 = vadd.xlane.f32.xlu0 %v448_v48  ;;  %v429_v56 = vmax.f32 %v391_v46, 0.0 }
 0x1d0   :  { %v432_v54 = vmax.f32 %v402_v50, 0.0  ;;  %470 = vadd.xlane.f32.xlu1 %v449_v52  ;;  %v454_v55 = vmul.f32 %v787_v17, %v431_v49 }
 0x1d1   :  { %v430_v57 = vmax.f32 %v394_v53, 0.0  ;;  %v452_v0 = vmul.f32 %v787_v17, %v429_v56 }
 0x1d2   :  { %v455_v58 = vmul.f32 %v787_v17, %v432_v54 }
 0x1d3   :  { %v636_v59 = vpop.f32.mrb[8].mxu1  ;;  %480 = vadd.xlane.f32.xlu0 %v454_v55  ;;  %v453_v2 = vmul.f32 %v787_v17, %v430_v57 }
 0x1d4   :  { %v406_v60 = vpop.f32.mrb[9].mxu1  ;;  %482 = vadd.xlane.f32.xlu1 %v455_v58  ;;  %v415_v61 = vadd.f32 %v636_v59, %v780_v11 }
 0x1d5   :  { %v407_v62 = vadd.f32 %v780_v11, %v406_v60  ;;  %v637_v63 = vpop.f32.mrb[10].mxu1 }
 0x1d6   :  { %v409_v1 = vpop.f32.mrb[11].mxu1  ;;  %v418_v4 = vadd.f32 %v637_v63, %v780_v11  ;;  %v435_v6 = vmax.f32 %v415_v61, 0.0 }
 0x1d7   :  { %v433_v3 = vmax.f32 %v407_v62, 0.0  ;;  %v410_v5 = vadd.f32 %v780_v11, %v409_v1  ;;  %476 = vadd.xlane.f32.xlu0 %v452_v0  ;;  %v493_v11 = vstv %s892_s6 }
 0x1d8   :  { %478 = vadd.xlane.f32.xlu1 %v453_v2  ;;  %v436_v9 = vmax.f32 %v418_v4, 0.0  ;;  %v458_v12 = vmul.f32 %v787_v17, %v435_v6 }
 0x1d9   :  { %v434_v7 = vmax.f32 %v410_v5, 0.0  ;;  %v456_v8 = vmul.f32 %v787_v17, %v433_v3 }
 0x1da   :  { %v459_v13 = vmul.f32 %v787_v17, %v436_v9 }
 0x1db   :  { %484 = vadd.xlane.f32.xlu0 %v456_v8  ;;  %v457_v10 = vmul.f32 %v787_v17, %v434_v7 }
 0x1dd   :  { %486 = vadd.xlane.f32.xlu1 %v457_v10 }
 0x1df   :  { %488 = vadd.xlane.f32.xlu0 %v458_v12 }
 0x1e1   :  { %490 = vadd.xlane.f32.xlu1 %v459_v13 }
 0x24f   :  { %v465_v14 = vpop.xlane.xlu1 %464 }
 0x250   :  { %v496_v15 = vadd.f32 %v493_v11, %v465_v14  ;;  %v461_v16 = vpop.xlane.xlu0 %460 }
 0x251   :  { %v494_v18 = vadd.f32 %v493_v11, %v461_v16 }
 0x252   :  { %513 = vst.msk [vmem:[%s893_s7 + $0x10] sm:$0xff] %vm510_vm1, %v496_v15 }
 0x253   :  { %511 = vst.msk [vmem:[%s893_s7] sm:$0xff] %vm510_vm1, %v494_v18  ;;  %v467_v17 = vpop.xlane.xlu1 %466 }
 0x254   :  { %v497_v19 = vadd.f32 %v493_v11, %v467_v17  ;;  %v463_v20 = vpop.xlane.xlu0 %462 }
 0x255   :  { %v495_v21 = vadd.f32 %v493_v11, %v463_v20 }
 0x256   :  { %514 = vst.msk [vmem:[%s893_s7 + $0x18] sm:$0xff] %vm510_vm1, %v497_v19 }
 0x257   :  { %512 = vst.msk [vmem:[%s893_s7 + $0x8] sm:$0xff] %vm510_vm1, %v495_v21 }
 0x258   :  { %v473_v22 = vpop.xlane.xlu0 %472 }
 0x259   :  { %v500_v23 = vadd.f32 %v493_v11, %v473_v22  ;;  %v475_v24 = vpop.xlane.xlu1 %474 }
 0x25a   :  { %v501_v25 = vadd.f32 %v493_v11, %v475_v24 }
 0x25b   :  { %517 = vst.msk [vmem:[%s893_s7 + $0x30] sm:$0xff] %vm510_vm1, %v500_v23 }
 0x25c   :  { %518 = vst.msk [vmem:[%s893_s7 + $0x38] sm:$0xff] %vm510_vm1, %v501_v25  ;;  %v469_v26 = vpop.xlane.xlu0 %468 }
 0x25d   :  { %v498_v27 = vadd.f32 %v493_v11, %v469_v26  ;;  %v471_v28 = vpop.xlane.xlu1 %470 }
 0x25e   :  { %v499_v29 = vadd.f32 %v493_v11, %v471_v28 }
 0x25f   :  { %515 = vst.msk [vmem:[%s893_s7 + $0x20] sm:$0xff] %vm510_vm1, %v498_v27 }
 0x260   :  { %516 = vst.msk [vmem:[%s893_s7 + $0x28] sm:$0xff] %vm510_vm1, %v499_v29  ;;  %v481_v30 = vpop.xlane.xlu0 %480 }
 0x261   :  { %v504_v31 = vadd.f32 %v493_v11, %v481_v30  ;;  %v483_v32 = vpop.xlane.xlu1 %482 }
 0x262   :  { %v505_v33 = vadd.f32 %v493_v11, %v483_v32 }
 0x263   :  { %521 = vst.msk [vmem:[%s893_s7 + $0x50] sm:$0xff] %vm510_vm1, %v504_v31 }
 0x264   :  { %522 = vst.msk [vmem:[%s893_s7 + $0x58] sm:$0xff] %vm510_vm1, %v505_v33  ;;  %v477_v34 = vpop.xlane.xlu0 %476 }
 0x265   :  { %v502_v35 = vadd.f32 %v493_v11, %v477_v34  ;;  %v479_v36 = vpop.xlane.xlu1 %478 }
 0x266   :  { %v503_v37 = vadd.f32 %v493_v11, %v479_v36 }
 0x267   :  { %519 = vst.msk [vmem:[%s893_s7 + $0x40] sm:$0xff] %vm510_vm1, %v502_v35 }
 0x268   :  { %520 = vst.msk [vmem:[%s893_s7 + $0x48] sm:$0xff] %vm510_vm1, %v503_v37  ;;  %v485_v38 = vpop.xlane.xlu0 %484 }
 0x269   :  { %v506_v39 = vadd.f32 %v493_v11, %v485_v38 }
 0x26a   :  { %v487_v40 = vpop.xlane.xlu1 %486 }
 0x26b   :  { %523 = vst.msk [vmem:[%s893_s7 + $0x60] sm:$0xff] %vm510_vm1, %v506_v39  ;;  %v507_v41 = vadd.f32 %v493_v11, %v487_v40 }
 0x26c   :  { %v489_v42 = vpop.xlane.xlu0 %488 }
 0x26d   :  { %524 = vst.msk [vmem:[%s893_s7 + $0x68] sm:$0xff] %vm510_vm1, %v507_v41  ;;  %v508_v43 = vadd.f32 %v493_v11, %v489_v42 }
 0x26e   :  { %v491_v44 = vpop.xlane.xlu1 %490 }
 0x26f   :  { %525 = vst.msk [vmem:[%s893_s7 + $0x70] sm:$0xff] %vm510_vm1, %v508_v43  ;;  %v509_v45 = vadd.f32 %v493_v11, %v491_v44 }
 0x271   :  { %526 = vst.msk [vmem:[%s893_s7 + $0x78] sm:$0xff] %vm510_vm1, %v509_v45 }

</bundles_post_ra>
